<compile_context>
chip_gen: v7x
topology: tpu7x:2x2x1
jax: 0.10.0
libtpu: 0.0.40
codegen_flags: <defaults>
</compile_context>

<pallas_src>
import functools
import math

import jax
import jax.numpy as jnp
from jax import lax
from jax.experimental import pallas as pl
from jax.experimental.pallas import tpu as pltpu


# ---------------------------------------------------------------------------
# Fused kernel: per grid step -> LN + input projection for a chunk of Tc
# timesteps (one MXU matmul), then the serial Tc-step recurrence.
# PyTorch gate order: i, f, g, o.
# ---------------------------------------------------------------------------
def _fused_lstm_kernel(Tc, H, bs, seq, apply_ln, write_y, needs_mask, mm_dtype,
                       x_ref, wih_ref, whh_ref, b_ref, g_ref, be_ref,
                       h0_ref, c0_ref, *out_refs):
    if write_y:
        y_ref, hT_ref, cT_ref = out_refs
    else:
        hT_ref, cT_ref = out_refs

    tc = pl.program_id(0)

    @pl.when(tc == 0)
    def _():
        hT_ref[...] = h0_ref[...]
        cT_ref[...] = c0_ref[...]

    # ---- chunk input projection: gates_x = LN(x_chunk) @ W_ih^T + bias ------
    x = x_ref[...]
    if apply_ln:
        xf = x.astype(jnp.float32)
        mean = jnp.mean(xf, axis=-1, keepdims=True)
        var = jnp.mean((xf - mean) ** 2, axis=-1, keepdims=True)
        xf = (xf - mean) * lax.rsqrt(var + 1e-5)
        xf = xf * g_ref[...] + be_ref[...]
        xin = xf.astype(mm_dtype)
    else:
        xin = x.astype(mm_dtype)
    gates_x = (jnp.dot(xin, wih_ref[...], preferred_element_type=jnp.float32)
               + b_ref[...])                                  # (Tc*bs, 4H) f32

    # ---- serial recurrence over the chunk -----------------------------------
    whh = whh_ref[...]            # (H, 4H), resident across the whole grid
    h = hT_ref[...]               # carry lives in the resident output blocks
    c = cT_ref[...]
    for i in range(Tc):           # static unroll over the chunk
        # h stays f32; only the MXU operand is cast (f32 accumulate).
        gates = gates_x[i * bs:(i + 1) * bs, :] + jnp.dot(
            h.astype(mm_dtype), whh, preferred_element_type=jnp.float32)
        # Full-128-lane transcendentals (2 EUP pushes for all four gates).
        sg = jax.nn.sigmoid(gates)
        th = jnp.tanh(gates)
        i_g = sg[:, 0 * H:1 * H]
        f_g = sg[:, 1 * H:2 * H]
        g_g = th[:, 2 * H:3 * H]
        o_g = sg[:, 3 * H:4 * H]
        c_new = f_g * c + i_g * g_g
        h_new = o_g * jnp.tanh(c_new)
        if needs_mask:
            # Padded tail steps must not advance the state.
            keep = ((tc * Tc + i) < seq).astype(jnp.float32)
            c = keep * c_new + (1.0 - keep) * c
            h = keep * h_new + (1.0 - keep) * h
        else:
            c = c_new
            h = h_new
        if write_y:
            y_ref[pl.ds(i * bs, bs), :] = h.astype(y_ref.dtype)
    hT_ref[...] = h
    cT_ref[...] = c


def lstm_layer(x, h0, c0, w_ih, w_hh, b_ih, b_hh, gamma=None, beta=None, *,
               matmul_dtype=jnp.bfloat16, y_dtype=jnp.float32,
               return_y=True, time_chunk=32):
    """One LSTM layer over the full sequence (optional fused pre-LayerNorm).

    x: (seq, bs, in_dim); h0/c0: (bs, H); w_ih: (4H, in_dim); w_hh: (4H, H).
    Returns (y, hT, cT).  If return_y=False, y is None and never written to HBM.
    """
    seq, bs, in_dim = x.shape
    H = w_hh.shape[1]
    four_h = 4 * H
    apply_ln = gamma is not None

    # Chunk selection: one full-sequence chunk if it fits, otherwise the largest
    # chunk <= time_chunk whose row count (Tc*bs) is a sublane (8) multiple;
    # pad seq (zeros) if it does not divide and mask the tail in-kernel.
    if seq <= time_chunk:
        Tc, seq_pad = seq, seq
    else:
        mult = 8 // math.gcd(8, bs)
        Tc = max(mult, (time_chunk // mult) * mult)
        seq_pad = ((seq + Tc - 1) // Tc) * Tc
    needs_mask = seq_pad != seq

    x2 = x.reshape(seq * bs, in_dim)
    if needs_mask:
        x2 = jnp.pad(x2, ((0, (seq_pad - seq) * bs), (0, 0)))

    wih_t = jnp.asarray(w_ih, jnp.float32).T.astype(matmul_dtype)   # (in_dim, 4H)
    whh_t = jnp.asarray(w_hh, jnp.float32).T.astype(matmul_dtype)   # (H, 4H)
    bias = (jnp.asarray(b_ih, jnp.float32)
            + jnp.asarray(b_hh, jnp.float32)).reshape(1, four_h)
    if apply_ln:
        g2 = jnp.asarray(gamma, jnp.float32).reshape(1, in_dim)
        be2 = jnp.asarray(beta, jnp.float32).reshape(1, in_dim)
    else:
        g2 = jnp.ones((1, in_dim), jnp.float32)
        be2 = jnp.zeros((1, in_dim), jnp.float32)
    h0 = jnp.asarray(h0, jnp.float32)
    c0 = jnp.asarray(c0, jnp.float32)

    kernel = functools.partial(_fused_lstm_kernel, Tc, H, bs, seq, apply_ln,
                               return_y, needs_mask, matmul_dtype)

    in_specs = [
        pl.BlockSpec((Tc * bs, in_dim), lambda t: (t, 0)),   # x chunk (pipelined)
        pl.BlockSpec((in_dim, four_h), lambda t: (0, 0)),    # W_ih^T (resident)
        pl.BlockSpec((H, four_h), lambda t: (0, 0)),         # W_hh^T (resident)
        pl.BlockSpec((1, four_h), lambda t: (0, 0)),         # fused bias
        pl.BlockSpec((1, in_dim), lambda t: (0, 0)),         # LN gamma
        pl.BlockSpec((1, in_dim), lambda t: (0, 0)),         # LN beta
        pl.BlockSpec((bs, H), lambda t: (0, 0)),             # h0
        pl.BlockSpec((bs, H), lambda t: (0, 0)),             # c0
    ]
    out_shape = []
    out_specs = []
    if return_y:
        out_shape.append(jax.ShapeDtypeStruct((seq_pad * bs, H), y_dtype))
        out_specs.append(pl.BlockSpec((Tc * bs, H), lambda t: (t, 0)))
    out_shape += [jax.ShapeDtypeStruct((bs, H), jnp.float32),   # hT (carry)
                  jax.ShapeDtypeStruct((bs, H), jnp.float32)]   # cT (carry)
    out_specs += [pl.BlockSpec((bs, H), lambda t: (0, 0)),
                  pl.BlockSpec((bs, H), lambda t: (0, 0))]

    outs = pl.pallas_call(
        kernel,
        out_shape=tuple(out_shape),
        grid_spec=pltpu.PrefetchScalarGridSpec(
            num_scalar_prefetch=0,
            grid=(seq_pad // Tc,),
            in_specs=in_specs,
            out_specs=out_specs,
        ),
        compiler_params=pltpu.CompilerParams(
            dimension_semantics=("arbitrary",)),   # sequential recurrence
    )(x2, wih_t, whh_t, bias, g2, be2, h0, c0)

    if return_y:
        y2, hT, cT = outs
        y = y2[: seq * bs].reshape(seq, bs, H)
        return y, hT, cT
    hT, cT = outs
    return None, hT, cT


# ---------------------------------------------------------------------------
# TrajLSTM parameter construction + forward pass
# ---------------------------------------------------------------------------
def init_traj_lstm_params(key, input_size, hidden_size, num_layers):
    assert input_size == hidden_size, (
        "TrajLSTM applies LayerNorm(hidden_size) to the raw input, which "
        "requires input_size == hidden_size.")
    H = hidden_size

    def lstm_params(key, in_dim):
        k1, k2, k3, k4 = jax.random.split(key, 4)
        s = 1.0 / jnp.sqrt(H)
        return {
            "w_ih": jax.random.uniform(k1, (4 * H, in_dim), jnp.float32, -s, s),
            "w_hh": jax.random.uniform(k2, (4 * H, H), jnp.float32, -s, s),
            "b_ih": jax.random.uniform(k3, (4 * H,), jnp.float32, -s, s),
            "b_hh": jax.random.uniform(k4, (4 * H,), jnp.float32, -s, s),
        }

    keys = jax.random.split(key, num_layers + 1)
    time_lstm = []
    in_dim = input_size
    for l in range(num_layers):
        time_lstm.append(lstm_params(keys[l], in_dim))
        in_dim = H
    depth_lstm = lstm_params(keys[num_layers], H)
    layernorms = [{"gamma": jnp.ones((H,), jnp.float32),
                   "beta": jnp.zeros((H,), jnp.float32)}
                  for _ in range(num_layers)]
    return {"hidden_size": H, "num_layers": num_layers,
            "time_lstm": time_lstm, "depth_lstm": depth_lstm,
            "layernorms": layernorms}


def traj_lstm_forward(params, x, hidden=None, batch_first=False,
                      matmul_dtype=jnp.bfloat16):
    """Forward pass equivalent to TrajLSTM.forward (dropout=0 / eval mode)."""
    if batch_first:
        x = jnp.transpose(x, (1, 0, 2))
    x = jnp.asarray(x, jnp.float32)
    seq, bs, _ = x.shape
    H = params["hidden_size"]
    num_layers = params["num_layers"]

    if hidden is None:
        h0s = [jnp.zeros((bs, H), jnp.float32) for _ in range(num_layers)]
        c0s = [jnp.zeros((bs, H), jnp.float32) for _ in range(num_layers)]
    else:
        all_h, all_c = hidden
        h0s = [all_h[l] for l in range(num_layers)]
        c0s = [all_c[l] for l in range(num_layers)]

    time_output = x
    time_results = []
    next_hidden = []
    next_cell = []
    for l in range(num_layers):
        p = params["time_lstm"][l]
        ln = params["layernorms"][l]
        is_last = (l == num_layers - 1)
        # Intermediate layer outputs are stored in bf16 (next layer casts to
        # bf16 for the MXU anyway); only the last layer's y stays f32 because
        # it contributes directly to the final output.
        y, hT, cT = lstm_layer(time_output, h0s[l], c0s[l],
                               p["w_ih"], p["w_hh"], p["b_ih"], p["b_hh"],
                               gamma=ln["gamma"], beta=ln["beta"],
                               matmul_dtype=matmul_dtype,
                               y_dtype=jnp.float32 if is_last else jnp.bfloat16)
        # nn.Dropout(p=0) (and eval-mode dropout) is identity.
        # TODO(synk): training-mode dropout (p>0) not implemented.
        time_output = y
        time_results.append(y)
        next_hidden.append(hT)
        next_cell.append(cT)

    # Depth LSTM over the layer axis, batch = seq*bs (no LayerNorm).  Its y is
    # never consumed -> "no y output" kernel variant skips that HBM write.
    depth_in = jnp.stack([r.astype(jnp.bfloat16) for r in time_results])
    depth_in = depth_in.reshape(num_layers, seq * bs, H)
    dp = params["depth_lstm"]
    _, _dh, dc = lstm_layer(depth_in,
                            jnp.zeros((seq * bs, H), jnp.float32),
                            jnp.zeros((seq * bs, H), jnp.float32),
                            dp["w_ih"], dp["w_hh"], dp["b_ih"], dp["b_hh"],
                            matmul_dtype=matmul_dtype, return_y=False)

    output = dc.reshape(seq, bs, H) + time_output          # depth_c + last time output
    next_state = (jnp.stack(next_hidden[::-1]),            # reference reverses layer order
                  jnp.stack(next_cell[::-1]))
    if batch_first:
        output = jnp.transpose(output, (1, 0, 2))
    return output, next_state


# ---------------------------------------------------------------------------
# Pure-JAX float32 reference (lax.scan) used for an in-script sanity check.
# ---------------------------------------------------------------------------
def _layernorm_ref(x, gamma, beta, eps=1e-5):
    mean = x.mean(-1, keepdims=True)
    var = ((x - mean) ** 2).mean(-1, keepdims=True)
    return (x - mean) / jnp.sqrt(var + eps) * gamma + beta


def _lstm_ref(x, h0, c0, w_ih, w_hh, b_ih, b_hh):
    def step(carry, xt):
        h, c = carry
        gates = xt @ w_ih.T + h @ w_hh.T + b_ih + b_hh
        ig, fg, gg, og = jnp.split(gates, 4, axis=-1)
        ig = jax.nn.sigmoid(ig)
        fg = jax.nn.sigmoid(fg)
        gg = jnp.tanh(gg)
        og = jax.nn.sigmoid(og)
        c = fg * c + ig * gg
        h = og * jnp.tanh(c)
        return (h, c), h
    (hT, cT), ys = lax.scan(step, (h0, c0), x)
    return ys, hT, cT


def traj_lstm_reference(params, x):
    seq, bs, _ = x.shape
    H = params["hidden_size"]
    L = params["num_layers"]
    z = jnp.zeros((bs, H), jnp.float32)
    time_output = x
    time_results, nh, nc = [], [], []
    for l in range(L):
        p = params["time_lstm"][l]
        ln = params["layernorms"][l]
        xi = _layernorm_ref(time_output, ln["gamma"], ln["beta"])
        y, hT, cT = _lstm_ref(xi, z, z, p["w_ih"], p["w_hh"], p["b_ih"], p["b_hh"])
        time_output = y
        time_results.append(y)
        nh.append(hT)
        nc.append(cT)
    tr = jnp.stack(time_results).reshape(L, seq * bs, H)
    dp = params["depth_lstm"]
    z2 = jnp.zeros((seq * bs, H), jnp.float32)
    _, _dh, dc = _lstm_ref(tr, z2, z2, dp["w_ih"], dp["w_hh"], dp["b_ih"], dp["b_hh"])
    out = dc.reshape(seq, bs, H) + time_output
    return out, (jnp.stack(nh[::-1]), jnp.stack(nc[::-1]))


if __name__ == "__main__":
    seq, bs = 8, 2
    input_size = hidden_size = 32
    num_layers = 2

    key = jax.random.PRNGKey(0)
    kp, kx = jax.random.split(key)
    params = init_traj_lstm_params(kp, input_size, hidden_size, num_layers)
    x = jax.random.normal(kx, (seq, bs, input_size), jnp.float32)

    output, (next_h, next_c) = traj_lstm_forward(params, x, hidden=None,
                                                 batch_first=False)
    jax.block_until_ready((output, next_h, next_c))

    assert output.shape == (seq, bs, hidden_size)
    assert next_h.shape == (num_layers, bs, hidden_size)
    assert next_c.shape == (num_layers, bs, hidden_size)
    assert bool(jnp.all(jnp.isfinite(output)))

    # Loose tolerance: kernel uses bf16 MXU operands (f32 accumulation) and
    # bf16 intermediate activations; reference is pure f32.
    ref_out, (ref_h, ref_c) = traj_lstm_reference(params, x)
    assert float(jnp.max(jnp.abs(output - ref_out))) < 0.15
    assert float(jnp.max(jnp.abs(next_h - ref_h))) < 0.15
    assert float(jnp.max(jnp.abs(next_c - ref_c))) < 0.15

    # Exercise the multi-chunk + non-divisible-seq (padded / masked) path.
    seq2 = 10
    x2t = jax.random.normal(jax.random.PRNGKey(1), (seq2, bs, hidden_size),
                            jnp.float32)
    p0 = params["time_lstm"][0]
    ln0 = params["layernorms"][0]
    z = jnp.zeros((bs, hidden_size), jnp.float32)
    y_k, h_k, c_k = lstm_layer(x2t, z, z,
                               p0["w_ih"], p0["w_hh"], p0["b_ih"], p0["b_hh"],
                               gamma=ln0["gamma"], beta=ln0["beta"],
                               time_chunk=4)
    jax.block_until_ready((y_k, h_k, c_k))
    xi = _layernorm_ref(x2t, ln0["gamma"], ln0["beta"])
    y_r, h_r, c_r = _lstm_ref(xi, z, z,
                              p0["w_ih"], p0["w_hh"], p0["b_ih"], p0["b_hh"])
    assert float(jnp.max(jnp.abs(y_k - y_r))) < 0.15
    assert float(jnp.max(jnp.abs(h_k - h_r))) < 0.15
    assert float(jnp.max(jnp.abs(c_k - c_r))) < 0.15

    print("KERNEL_OK")
</pallas_src>

<mosaic_0001>
module attributes {stable_mosaic.version = 11 : i64} {
  func.func @_fused_lstm_kernel(%arg0: i32, %arg1: memref<16x32xf32, #tpu.memory_space<vmem>>, %arg2: memref<32x128xbf16, #tpu.memory_space<vmem>>, %arg3: memref<32x128xbf16, #tpu.memory_space<vmem>>, %arg4: memref<1x128xf32, #tpu.memory_space<vmem>>, %arg5: memref<1x32xf32, #tpu.memory_space<vmem>>, %arg6: memref<1x32xf32, #tpu.memory_space<vmem>>, %arg7: memref<2x32xf32, #tpu.memory_space<vmem>>, %arg8: memref<2x32xf32, #tpu.memory_space<vmem>>, %arg9: memref<16x32xbf16, #tpu.memory_space<vmem>>, %arg10: memref<2x32xf32, #tpu.memory_space<vmem>>, %arg11: memref<2x32xf32, #tpu.memory_space<vmem>>) attributes {dimension_semantics = [#tpu.dimension_semantics<arbitrary>], iteration_bounds = array<i64: 1>, scalar_prefetch = 0 : i64, scratch_operands = 0 : i64, tpu.core_type = #tpu.core_type<tc>, window_params = [{transform_indices = @transform_0, window_bounds = array<i64: 16, 32>}, {pipeline_mode = #tpu.pipeline_mode<synchronous>, transform_indices = @transform_1, window_bounds = array<i64: 32, 128>}, {pipeline_mode = #tpu.pipeline_mode<synchronous>, transform_indices = @transform_2, window_bounds = array<i64: 32, 128>}, {pipeline_mode = #tpu.pipeline_mode<synchronous>, transform_indices = @transform_3, window_bounds = array<i64: 1, 128>}, {pipeline_mode = #tpu.pipeline_mode<synchronous>, transform_indices = @transform_4, window_bounds = array<i64: 1, 32>}, {pipeline_mode = #tpu.pipeline_mode<synchronous>, transform_indices = @transform_5, window_bounds = array<i64: 1, 32>}, {pipeline_mode = #tpu.pipeline_mode<synchronous>, transform_indices = @transform_6, window_bounds = array<i64: 2, 32>}, {pipeline_mode = #tpu.pipeline_mode<synchronous>, transform_indices = @transform_7, window_bounds = array<i64: 2, 32>}, {transform_indices = @transform_8, window_bounds = array<i64: 16, 32>}, {pipeline_mode = #tpu.pipeline_mode<synchronous>, transform_indices = @transform_9, window_bounds = array<i64: 2, 32>}, {pipeline_mode = #tpu.pipeline_mode<synchronous>, transform_indices = @transform_10, window_bounds = array<i64: 2, 32>}]} {
    %c0_i32 = arith.constant 0 : i32
    %0 = arith.cmpi eq, %arg0, %c0_i32 : i32
    %1 = arith.extui %0 : i1 to i32
    %c0_i32_0 = arith.constant 0 : i32
    %2 = arith.cmpi ne, %1, %c0_i32_0 : i32
    scf.if %2 {
      %c0_50 = arith.constant 0 : index
      %c0_51 = arith.constant 0 : index
      %207 = vector.load %arg7[%c0_50, %c0_51] : memref<2x32xf32, #tpu.memory_space<vmem>>, vector<2x32xf32>
      %c0_52 = arith.constant 0 : index
      %c0_53 = arith.constant 0 : index
      %208 = vector.load %arg10[%c0_52, %c0_53] : memref<2x32xf32, #tpu.memory_space<vmem>>, vector<2x32xf32>
      tpu.vector_store %arg10[%c0_52, %c0_53], %207 {strides = array<i32>} : memref<2x32xf32, #tpu.memory_space<vmem>>, vector<2x32xf32>,
      %c0_54 = arith.constant 0 : index
      %c0_55 = arith.constant 0 : index
      %209 = vector.load %arg8[%c0_54, %c0_55] : memref<2x32xf32, #tpu.memory_space<vmem>>, vector<2x32xf32>
      %c0_56 = arith.constant 0 : index
      %c0_57 = arith.constant 0 : index
      %210 = vector.load %arg11[%c0_56, %c0_57] : memref<2x32xf32, #tpu.memory_space<vmem>>, vector<2x32xf32>
      tpu.vector_store %arg11[%c0_56, %c0_57], %209 {strides = array<i32>} : memref<2x32xf32, #tpu.memory_space<vmem>>, vector<2x32xf32>,
    } else {
    }
    %c0 = arith.constant 0 : index
    %c0_1 = arith.constant 0 : index
    %3 = vector.load %arg1[%c0, %c0_1] : memref<16x32xf32, #tpu.memory_space<vmem>>, vector<16x32xf32>
    %cst = arith.constant dense<0.000000e+00> : vector<16xf32>
    %4 = vector.multi_reduction <add>, %3, %cst [1] : vector<16x32xf32> to vector<16xf32>
    %5 = vector.shape_cast %4 : vector<16xf32> to vector<16x1xf32>
    %cst_2 = arith.constant 3.200000e+01 : f32
    %6 = vector.broadcast %cst_2 : f32 to vector<16x1xf32>
    %7 = arith.divf %5, %6 : vector<16x1xf32>
    %8 = vector.broadcast %7 : vector<16x1xf32> to vector<16x32xf32>
    %9 = arith.subf %3, %8 : vector<16x32xf32>
    %10 = arith.mulf %9, %9 : vector<16x32xf32>
    %cst_3 = arith.constant dense<0.000000e+00> : vector<16xf32>
    %11 = vector.multi_reduction <add>, %10, %cst_3 [1] : vector<16x32xf32> to vector<16xf32>
    %12 = vector.shape_cast %11 : vector<16xf32> to vector<16x1xf32>
    %cst_4 = arith.constant 3.200000e+01 : f32
    %13 = vector.broadcast %cst_4 : f32 to vector<16x1xf32>
    %14 = arith.divf %12, %13 : vector<16x1xf32>
    %15 = vector.broadcast %7 : vector<16x1xf32> to vector<16x32xf32>
    %16 = arith.subf %3, %15 : vector<16x32xf32>
    %cst_5 = arith.constant 9.99999974E-6 : f32
    %17 = vector.broadcast %cst_5 : f32 to vector<16x1xf32>
    %18 = arith.addf %14, %17 : vector<16x1xf32>
    %19 = math.rsqrt %18 : vector<16x1xf32>
    %20 = vector.broadcast %19 : vector<16x1xf32> to vector<16x32xf32>
    %21 = arith.mulf %16, %20 : vector<16x32xf32>
    %c0_6 = arith.constant 0 : index
    %c0_7 = arith.constant 0 : index
    %22 = vector.load %arg5[%c0_6, %c0_7] : memref<1x32xf32, #tpu.memory_space<vmem>>, vector<1x32xf32>
    %23 = vector.broadcast %22 : vector<1x32xf32> to vector<16x32xf32>
    %24 = arith.mulf %21, %23 : vector<16x32xf32>
    %c0_8 = arith.constant 0 : index
    %c0_9 = arith.constant 0 : index
    %25 = vector.load %arg6[%c0_8, %c0_9] : memref<1x32xf32, #tpu.memory_space<vmem>>, vector<1x32xf32>
    %26 = vector.broadcast %25 : vector<1x32xf32> to vector<16x32xf32>
    %27 = arith.addf %24, %26 : vector<16x32xf32>
    %28 = arith.truncf %27 : vector<16x32xf32> to vector<16x32xbf16>
    %c0_10 = arith.constant 0 : index
    %c0_11 = arith.constant 0 : index
    %29 = vector.load %arg2[%c0_10, %c0_11] : memref<32x128xbf16, #tpu.memory_space<vmem>>, vector<32x128xbf16>
    %cst_12 = arith.constant dense<0.000000e+00> : vector<16x128xf32>
    %30 = tpu.matmul %28, %29, %cst_12 {dimension_numbers = #tpu.dot_dimension_numbers<[1], [0], [0], [1], [0, 0, 1, 1], [], []>} : vector<16x32xbf16>, vector<32x128xbf16>, vector<16x128xf32> -> vector<16x128xf32>
    %c0_13 = arith.constant 0 : index
    %c0_14 = arith.constant 0 : index
    %31 = vector.load %arg4[%c0_13, %c0_14] : memref<1x128xf32, #tpu.memory_space<vmem>>, vector<1x128xf32>
    %32 = vector.broadcast %31 : vector<1x128xf32> to vector<16x128xf32>
    %33 = arith.addf %30, %32 : vector<16x128xf32>
    %c0_15 = arith.constant 0 : index
    %c0_16 = arith.constant 0 : index
    %34 = vector.load %arg3[%c0_15, %c0_16] : memref<32x128xbf16, #tpu.memory_space<vmem>>, vector<32x128xbf16>
    %c0_17 = arith.constant 0 : index
    %c0_18 = arith.constant 0 : index
    %35 = vector.load %arg10[%c0_17, %c0_18] : memref<2x32xf32, #tpu.memory_space<vmem>>, vector<2x32xf32>
    %c0_19 = arith.constant 0 : index
    %c0_20 = arith.constant 0 : index
    %36 = vector.load %arg11[%c0_19, %c0_20] : memref<2x32xf32, #tpu.memory_space<vmem>>, vector<2x32xf32>
    %37 = vector.extract_strided_slice %33 {offsets = [0, 0], sizes = [2, 128], strides = [1, 1]} : vector<16x128xf32> to vector<2x128xf32>
    %38 = arith.truncf %35 : vector<2x32xf32> to vector<2x32xbf16>
    %cst_21 = arith.constant dense<0.000000e+00> : vector<2x128xf32>
    %39 = tpu.matmul %38, %34, %cst_21 {dimension_numbers = #tpu.dot_dimension_numbers<[1], [0], [0], [1], [0, 0, 1, 1], [], []>} : vector<2x32xbf16>, vector<32x128xbf16>, vector<2x128xf32> -> vector<2x128xf32>
    %40 = arith.addf %37, %39 : vector<2x128xf32>
    %41 = arith.negf %40 : vector<2x128xf32>
    %42 = math.exp %41 : vector<2x128xf32>
    %cst_22 = arith.constant 1.000000e+00 : f32
    %43 = vector.broadcast %cst_22 : f32 to vector<2x128xf32>
    %44 = arith.addf %43, %42 : vector<2x128xf32>
    %45 = arith.divf %43, %44 : vector<2x128xf32>
    %46 = math.tanh %40 : vector<2x128xf32>
    %47 = vector.extract_strided_slice %45 {offsets = [0, 0], sizes = [2, 32], strides = [1, 1]} : vector<2x128xf32> to vector<2x32xf32>
    %48 = vector.extract_strided_slice %45 {offsets = [0, 32], sizes = [2, 32], strides = [1, 1]} : vector<2x128xf32> to vector<2x32xf32>
    %49 = vector.extract_strided_slice %46 {offsets = [0, 64], sizes = [2, 32], strides = [1, 1]} : vector<2x128xf32> to vector<2x32xf32>
    %50 = vector.extract_strided_slice %45 {offsets = [0, 96], sizes = [2, 32], strides = [1, 1]} : vector<2x128xf32> to vector<2x32xf32>
    %51 = arith.mulf %48, %36 : vector<2x32xf32>
    %52 = arith.mulf %47, %49 : vector<2x32xf32>
    %53 = arith.addf %51, %52 : vector<2x32xf32>
    %54 = math.tanh %53 : vector<2x32xf32>
    %55 = arith.mulf %50, %54 : vector<2x32xf32>
    %56 = arith.truncf %55 : vector<2x32xf32> to vector<2x32xbf16>
    %c0_23 = arith.constant 0 : index
    %c0_24 = arith.constant 0 : index
    %57 = vector.load %arg9[%c0_23, %c0_24] : memref<16x32xbf16, #tpu.memory_space<vmem>>, vector<2x32xbf16>
    tpu.vector_store %arg9[%c0_23, %c0_24], %56 {strides = array<i32>} : memref<16x32xbf16, #tpu.memory_space<vmem>>, vector<2x32xbf16>,
    %58 = vector.extract_strided_slice %33 {offsets = [2, 0], sizes = [2, 128], strides = [1, 1]} : vector<16x128xf32> to vector<2x128xf32>
    %59 = arith.truncf %55 : vector<2x32xf32> to vector<2x32xbf16>
    %cst_25 = arith.constant dense<0.000000e+00> : vector<2x128xf32>
    %60 = tpu.matmul %59, %34, %cst_25 {dimension_numbers = #tpu.dot_dimension_numbers<[1], [0], [0], [1], [0, 0, 1, 1], [], []>} : vector<2x32xbf16>, vector<32x128xbf16>, vector<2x128xf32> -> vector<2x128xf32>
    %61 = arith.addf %58, %60 : vector<2x128xf32>
    %62 = arith.negf %61 : vector<2x128xf32>
    %63 = math.exp %62 : vector<2x128xf32>
    %cst_26 = arith.constant 1.000000e+00 : f32
    %64 = vector.broadcast %cst_26 : f32 to vector<2x128xf32>
    %65 = arith.addf %64, %63 : vector<2x128xf32>
    %66 = arith.divf %64, %65 : vector<2x128xf32>
    %67 = math.tanh %61 : vector<2x128xf32>
    %68 = vector.extract_strided_slice %66 {offsets = [0, 0], sizes = [2, 32], strides = [1, 1]} : vector<2x128xf32> to vector<2x32xf32>
    %69 = vector.extract_strided_slice %66 {offsets = [0, 32], sizes = [2, 32], strides = [1, 1]} : vector<2x128xf32> to vector<2x32xf32>
    %70 = vector.extract_strided_slice %67 {offsets = [0, 64], sizes = [2, 32], strides = [1, 1]} : vector<2x128xf32> to vector<2x32xf32>
    %71 = vector.extract_strided_slice %66 {offsets = [0, 96], sizes = [2, 32], strides = [1, 1]} : vector<2x128xf32> to vector<2x32xf32>
    %72 = arith.mulf %69, %53 : vector<2x32xf32>
    %73 = arith.mulf %68, %70 : vector<2x32xf32>
    %74 = arith.addf %72, %73 : vector<2x32xf32>
    %75 = math.tanh %74 : vector<2x32xf32>
    %76 = arith.mulf %71, %75 : vector<2x32xf32>
    %77 = arith.truncf %76 : vector<2x32xf32> to vector<2x32xbf16>
    %c2 = arith.constant 2 : index
    %c0_27 = arith.constant 0 : index
    %78 = vector.load %arg9[%c2, %c0_27] : memref<16x32xbf16, #tpu.memory_space<vmem>>, vector<2x32xbf16>
    tpu.vector_store %arg9[%c2, %c0_27], %77 {strides = array<i32>} : memref<16x32xbf16, #tpu.memory_space<vmem>>, vector<2x32xbf16>,
    %79 = vector.extract_strided_slice %33 {offsets = [4, 0], sizes = [2, 128], strides = [1, 1]} : vector<16x128xf32> to vector<2x128xf32>
    %80 = arith.truncf %76 : vector<2x32xf32> to vector<2x32xbf16>
    %cst_28 = arith.constant dense<0.000000e+00> : vector<2x128xf32>
    %81 = tpu.matmul %80, %34, %cst_28 {dimension_numbers = #tpu.dot_dimension_numbers<[1], [0], [0], [1], [0, 0, 1, 1], [], []>} : vector<2x32xbf16>, vector<32x128xbf16>, vector<2x128xf32> -> vector<2x128xf32>
    %82 = arith.addf %79, %81 : vector<2x128xf32>
    %83 = arith.negf %82 : vector<2x128xf32>
    %84 = math.exp %83 : vector<2x128xf32>
    %cst_29 = arith.constant 1.000000e+00 : f32
    %85 = vector.broadcast %cst_29 : f32 to vector<2x128xf32>
    %86 = arith.addf %85, %84 : vector<2x128xf32>
    %87 = arith.divf %85, %86 : vector<2x128xf32>
    %88 = math.tanh %82 : vector<2x128xf32>
    %89 = vector.extract_strided_slice %87 {offsets = [0, 0], sizes = [2, 32], strides = [1, 1]} : vector<2x128xf32> to vector<2x32xf32>
    %90 = vector.extract_strided_slice %87 {offsets = [0, 32], sizes = [2, 32], strides = [1, 1]} : vector<2x128xf32> to vector<2x32xf32>
    %91 = vector.extract_strided_slice %88 {offsets = [0, 64], sizes = [2, 32], strides = [1, 1]} : vector<2x128xf32> to vector<2x32xf32>
    %92 = vector.extract_strided_slice %87 {offsets = [0, 96], sizes = [2, 32], strides = [1, 1]} : vector<2x128xf32> to vector<2x32xf32>
    %93 = arith.mulf %90, %74 : vector<2x32xf32>
    %94 = arith.mulf %89, %91 : vector<2x32xf32>
    %95 = arith.addf %93, %94 : vector<2x32xf32>
    %96 = math.tanh %95 : vector<2x32xf32>
    %97 = arith.mulf %92, %96 : vector<2x32xf32>
    %98 = arith.truncf %97 : vector<2x32xf32> to vector<2x32xbf16>
    %c4 = arith.constant 4 : index
    %c0_30 = arith.constant 0 : index
    %99 = vector.load %arg9[%c4, %c0_30] : memref<16x32xbf16, #tpu.memory_space<vmem>>, vector<2x32xbf16>
    tpu.vector_store %arg9[%c4, %c0_30], %98 {strides = array<i32>} : memref<16x32xbf16, #tpu.memory_space<vmem>>, vector<2x32xbf16>,
    %100 = vector.extract_strided_slice %33 {offsets = [6, 0], sizes = [2, 128], strides = [1, 1]} : vector<16x128xf32> to vector<2x128xf32>
    %101 = arith.truncf %97 : vector<2x32xf32> to vector<2x32xbf16>
    %cst_31 = arith.constant dense<0.000000e+00> : vector<2x128xf32>
    %102 = tpu.matmul %101, %34, %cst_31 {dimension_numbers = #tpu.dot_dimension_numbers<[1], [0], [0], [1], [0, 0, 1, 1], [], []>} : vector<2x32xbf16>, vector<32x128xbf16>, vector<2x128xf32> -> vector<2x128xf32>
    %103 = arith.addf %100, %102 : vector<2x128xf32>
    %104 = arith.negf %103 : vector<2x128xf32>
    %105 = math.exp %104 : vector<2x128xf32>
    %cst_32 = arith.constant 1.000000e+00 : f32
    %106 = vector.broadcast %cst_32 : f32 to vector<2x128xf32>
    %107 = arith.addf %106, %105 : vector<2x128xf32>
    %108 = arith.divf %106, %107 : vector<2x128xf32>
    %109 = math.tanh %103 : vector<2x128xf32>
    %110 = vector.extract_strided_slice %108 {offsets = [0, 0], sizes = [2, 32], strides = [1, 1]} : vector<2x128xf32> to vector<2x32xf32>
    %111 = vector.extract_strided_slice %108 {offsets = [0, 32], sizes = [2, 32], strides = [1, 1]} : vector<2x128xf32> to vector<2x32xf32>
    %112 = vector.extract_strided_slice %109 {offsets = [0, 64], sizes = [2, 32], strides = [1, 1]} : vector<2x128xf32> to vector<2x32xf32>
    %113 = vector.extract_strided_slice %108 {offsets = [0, 96], sizes = [2, 32], strides = [1, 1]} : vector<2x128xf32> to vector<2x32xf32>
    %114 = arith.mulf %111, %95 : vector<2x32xf32>
    %115 = arith.mulf %110, %112 : vector<2x32xf32>
    %116 = arith.addf %114, %115 : vector<2x32xf32>
    %117 = math.tanh %116 : vector<2x32xf32>
    %118 = arith.mulf %113, %117 : vector<2x32xf32>
    %119 = arith.truncf %118 : vector<2x32xf32> to vector<2x32xbf16>
    %c6 = arith.constant 6 : index
    %c0_33 = arith.constant 0 : index
    %120 = vector.load %arg9[%c6, %c0_33] : memref<16x32xbf16, #tpu.memory_space<vmem>>, vector<2x32xbf16>
    tpu.vector_store %arg9[%c6, %c0_33], %119 {strides = array<i32>} : memref<16x32xbf16, #tpu.memory_space<vmem>>, vector<2x32xbf16>,
    %121 = vector.extract_strided_slice %33 {offsets = [8, 0], sizes = [2, 128], strides = [1, 1]} : vector<16x128xf32> to vector<2x128xf32>
    %122 = arith.truncf %118 : vector<2x32xf32> to vector<2x32xbf16>
    %cst_34 = arith.constant dense<0.000000e+00> : vector<2x128xf32>
    %123 = tpu.matmul %122, %34, %cst_34 {dimension_numbers = #tpu.dot_dimension_numbers<[1], [0], [0], [1], [0, 0, 1, 1], [], []>} : vector<2x32xbf16>, vector<32x128xbf16>, vector<2x128xf32> -> vector<2x128xf32>
    %124 = arith.addf %121, %123 : vector<2x128xf32>
    %125 = arith.negf %124 : vector<2x128xf32>
    %126 = math.exp %125 : vector<2x128xf32>
    %cst_35 = arith.constant 1.000000e+00 : f32
    %127 = vector.broadcast %cst_35 : f32 to vector<2x128xf32>
    %128 = arith.addf %127, %126 : vector<2x128xf32>
    %129 = arith.divf %127, %128 : vector<2x128xf32>
    %130 = math.tanh %124 : vector<2x128xf32>
    %131 = vector.extract_strided_slice %129 {offsets = [0, 0], sizes = [2, 32], strides = [1, 1]} : vector<2x128xf32> to vector<2x32xf32>
    %132 = vector.extract_strided_slice %129 {offsets = [0, 32], sizes = [2, 32], strides = [1, 1]} : vector<2x128xf32> to vector<2x32xf32>
    %133 = vector.extract_strided_slice %130 {offsets = [0, 64], sizes = [2, 32], strides = [1, 1]} : vector<2x128xf32> to vector<2x32xf32>
    %134 = vector.extract_strided_slice %129 {offsets = [0, 96], sizes = [2, 32], strides = [1, 1]} : vector<2x128xf32> to vector<2x32xf32>
    %135 = arith.mulf %132, %116 : vector<2x32xf32>
    %136 = arith.mulf %131, %133 : vector<2x32xf32>
    %137 = arith.addf %135, %136 : vector<2x32xf32>
    %138 = math.tanh %137 : vector<2x32xf32>
    %139 = arith.mulf %134, %138 : vector<2x32xf32>
    %140 = arith.truncf %139 : vector<2x32xf32> to vector<2x32xbf16>
    %c8 = arith.constant 8 : index
    %c0_36 = arith.constant 0 : index
    %141 = vector.load %arg9[%c8, %c0_36] : memref<16x32xbf16, #tpu.memory_space<vmem>>, vector<2x32xbf16>
    tpu.vector_store %arg9[%c8, %c0_36], %140 {strides = array<i32>} : memref<16x32xbf16, #tpu.memory_space<vmem>>, vector<2x32xbf16>,
    %142 = vector.extract_strided_slice %33 {offsets = [10, 0], sizes = [2, 128], strides = [1, 1]} : vector<16x128xf32> to vector<2x128xf32>
    %143 = arith.truncf %139 : vector<2x32xf32> to vector<2x32xbf16>
    %cst_37 = arith.constant dense<0.000000e+00> : vector<2x128xf32>
    %144 = tpu.matmul %143, %34, %cst_37 {dimension_numbers = #tpu.dot_dimension_numbers<[1], [0], [0], [1], [0, 0, 1, 1], [], []>} : vector<2x32xbf16>, vector<32x128xbf16>, vector<2x128xf32> -> vector<2x128xf32>
    %145 = arith.addf %142, %144 : vector<2x128xf32>
    %146 = arith.negf %145 : vector<2x128xf32>
    %147 = math.exp %146 : vector<2x128xf32>
    %cst_38 = arith.constant 1.000000e+00 : f32
    %148 = vector.broadcast %cst_38 : f32 to vector<2x128xf32>
    %149 = arith.addf %148, %147 : vector<2x128xf32>
    %150 = arith.divf %148, %149 : vector<2x128xf32>
    %151 = math.tanh %145 : vector<2x128xf32>
    %152 = vector.extract_strided_slice %150 {offsets = [0, 0], sizes = [2, 32], strides = [1, 1]} : vector<2x128xf32> to vector<2x32xf32>
    %153 = vector.extract_strided_slice %150 {offsets = [0, 32], sizes = [2, 32], strides = [1, 1]} : vector<2x128xf32> to vector<2x32xf32>
    %154 = vector.extract_strided_slice %151 {offsets = [0, 64], sizes = [2, 32], strides = [1, 1]} : vector<2x128xf32> to vector<2x32xf32>
    %155 = vector.extract_strided_slice %150 {offsets = [0, 96], sizes = [2, 32], strides = [1, 1]} : vector<2x128xf32> to vector<2x32xf32>
    %156 = arith.mulf %153, %137 : vector<2x32xf32>
    %157 = arith.mulf %152, %154 : vector<2x32xf32>
    %158 = arith.addf %156, %157 : vector<2x32xf32>
    %159 = math.tanh %158 : vector<2x32xf32>
    %160 = arith.mulf %155, %159 : vector<2x32xf32>
    %161 = arith.truncf %160 : vector<2x32xf32> to vector<2x32xbf16>
    %c10 = arith.constant 10 : index
    %c0_39 = arith.constant 0 : index
    %162 = vector.load %arg9[%c10, %c0_39] : memref<16x32xbf16, #tpu.memory_space<vmem>>, vector<2x32xbf16>
    tpu.vector_store %arg9[%c10, %c0_39], %161 {strides = array<i32>} : memref<16x32xbf16, #tpu.memory_space<vmem>>, vector<2x32xbf16>,
    %163 = vector.extract_strided_slice %33 {offsets = [12, 0], sizes = [2, 128], strides = [1, 1]} : vector<16x128xf32> to vector<2x128xf32>
    %164 = arith.truncf %160 : vector<2x32xf32> to vector<2x32xbf16>
    %cst_40 = arith.constant dense<0.000000e+00> : vector<2x128xf32>
    %165 = tpu.matmul %164, %34, %cst_40 {dimension_numbers = #tpu.dot_dimension_numbers<[1], [0], [0], [1], [0, 0, 1, 1], [], []>} : vector<2x32xbf16>, vector<32x128xbf16>, vector<2x128xf32> -> vector<2x128xf32>
    %166 = arith.addf %163, %165 : vector<2x128xf32>
    %167 = arith.negf %166 : vector<2x128xf32>
    %168 = math.exp %167 : vector<2x128xf32>
    %cst_41 = arith.constant 1.000000e+00 : f32
    %169 = vector.broadcast %cst_41 : f32 to vector<2x128xf32>
    %170 = arith.addf %169, %168 : vector<2x128xf32>
    %171 = arith.divf %169, %170 : vector<2x128xf32>
    %172 = math.tanh %166 : vector<2x128xf32>
    %173 = vector.extract_strided_slice %171 {offsets = [0, 0], sizes = [2, 32], strides = [1, 1]} : vector<2x128xf32> to vector<2x32xf32>
    %174 = vector.extract_strided_slice %171 {offsets = [0, 32], sizes = [2, 32], strides = [1, 1]} : vector<2x128xf32> to vector<2x32xf32>
    %175 = vector.extract_strided_slice %172 {offsets = [0, 64], sizes = [2, 32], strides = [1, 1]} : vector<2x128xf32> to vector<2x32xf32>
    %176 = vector.extract_strided_slice %171 {offsets = [0, 96], sizes = [2, 32], strides = [1, 1]} : vector<2x128xf32> to vector<2x32xf32>
    %177 = arith.mulf %174, %158 : vector<2x32xf32>
    %178 = arith.mulf %173, %175 : vector<2x32xf32>
    %179 = arith.addf %177, %178 : vector<2x32xf32>
    %180 = math.tanh %179 : vector<2x32xf32>
    %181 = arith.mulf %176, %180 : vector<2x32xf32>
    %182 = arith.truncf %181 : vector<2x32xf32> to vector<2x32xbf16>
    %c12 = arith.constant 12 : index
    %c0_42 = arith.constant 0 : index
    %183 = vector.load %arg9[%c12, %c0_42] : memref<16x32xbf16, #tpu.memory_space<vmem>>, vector<2x32xbf16>
    tpu.vector_store %arg9[%c12, %c0_42], %182 {strides = array<i32>} : memref<16x32xbf16, #tpu.memory_space<vmem>>, vector<2x32xbf16>,
    %184 = vector.extract_strided_slice %33 {offsets = [14, 0], sizes = [2, 128], strides = [1, 1]} : vector<16x128xf32> to vector<2x128xf32>
    %185 = arith.truncf %181 : vector<2x32xf32> to vector<2x32xbf16>
    %cst_43 = arith.constant dense<0.000000e+00> : vector<2x128xf32>
    %186 = tpu.matmul %185, %34, %cst_43 {dimension_numbers = #tpu.dot_dimension_numbers<[1], [0], [0], [1], [0, 0, 1, 1], [], []>} : vector<2x32xbf16>, vector<32x128xbf16>, vector<2x128xf32> -> vector<2x128xf32>
    %187 = arith.addf %184, %186 : vector<2x128xf32>
    %188 = arith.negf %187 : vector<2x128xf32>
    %189 = math.exp %188 : vector<2x128xf32>
    %cst_44 = arith.constant 1.000000e+00 : f32
    %190 = vector.broadcast %cst_44 : f32 to vector<2x128xf32>
    %191 = arith.addf %190, %189 : vector<2x128xf32>
    %192 = arith.divf %190, %191 : vector<2x128xf32>
    %193 = math.tanh %187 : vector<2x128xf32>
    %194 = vector.extract_strided_slice %192 {offsets = [0, 0], sizes = [2, 32], strides = [1, 1]} : vector<2x128xf32> to vector<2x32xf32>
    %195 = vector.extract_strided_slice %192 {offsets = [0, 32], sizes = [2, 32], strides = [1, 1]} : vector<2x128xf32> to vector<2x32xf32>
    %196 = vector.extract_strided_slice %193 {offsets = [0, 64], sizes = [2, 32], strides = [1, 1]} : vector<2x128xf32> to vector<2x32xf32>
    %197 = vector.extract_strided_slice %192 {offsets = [0, 96], sizes = [2, 32], strides = [1, 1]} : vector<2x128xf32> to vector<2x32xf32>
    %198 = arith.mulf %195, %179 : vector<2x32xf32>
    %199 = arith.mulf %194, %196 : vector<2x32xf32>
    %200 = arith.addf %198, %199 : vector<2x32xf32>
    %201 = math.tanh %200 : vector<2x32xf32>
    %202 = arith.mulf %197, %201 : vector<2x32xf32>
    %203 = arith.truncf %202 : vector<2x32xf32> to vector<2x32xbf16>
    %c14 = arith.constant 14 : index
    %c0_45 = arith.constant 0 : index
    %204 = vector.load %arg9[%c14, %c0_45] : memref<16x32xbf16, #tpu.memory_space<vmem>>, vector<2x32xbf16>
    tpu.vector_store %arg9[%c14, %c0_45], %203 {strides = array<i32>} : memref<16x32xbf16, #tpu.memory_space<vmem>>, vector<2x32xbf16>,
    %c0_46 = arith.constant 0 : index
    %c0_47 = arith.constant 0 : index
    %205 = vector.load %arg10[%c0_46, %c0_47] : memref<2x32xf32, #tpu.memory_space<vmem>>, vector<2x32xf32>
    tpu.vector_store %arg10[%c0_46, %c0_47], %202 {strides = array<i32>} : memref<2x32xf32, #tpu.memory_space<vmem>>, vector<2x32xf32>,
    %c0_48 = arith.constant 0 : index
    %c0_49 = arith.constant 0 : index
    %206 = vector.load %arg11[%c0_48, %c0_49] : memref<2x32xf32, #tpu.memory_space<vmem>>, vector<2x32xf32>
    tpu.vector_store %arg11[%c0_48, %c0_49], %200 {strides = array<i32>} : memref<2x32xf32, #tpu.memory_space<vmem>>, vector<2x32xf32>,
    return
  }
  func.func @transform_0(%arg0: i32) -> (i32, i32) {
    %c0_i32 = arith.constant 0 : i32
    %c0_i32_0 = arith.constant 0 : i32
    return %arg0, %c0_i32 : i32, i32
  }
  func.func @transform_1(%arg0: i32) -> (i32, i32) {
    %c0_i32 = arith.constant 0 : i32
    %c0_i32_0 = arith.constant 0 : i32
    %c0_i32_1 = arith.constant 0 : i32
    return %c0_i32, %c0_i32_0 : i32, i32
  }
  func.func @transform_2(%arg0: i32) -> (i32, i32) {
    %c0_i32 = arith.constant 0 : i32
    %c0_i32_0 = arith.constant 0 : i32
    %c0_i32_1 = arith.constant 0 : i32
    return %c0_i32, %c0_i32_0 : i32, i32
  }
  func.func @transform_3(%arg0: i32) -> (i32, i32) {
    %c0_i32 = arith.constant 0 : i32
    %c0_i32_0 = arith.constant 0 : i32
    %c0_i32_1 = arith.constant 0 : i32
    return %c0_i32, %c0_i32_0 : i32, i32
  }
  func.func @transform_4(%arg0: i32) -> (i32, i32) {
    %c0_i32 = arith.constant 0 : i32
    %c0_i32_0 = arith.constant 0 : i32
    %c0_i32_1 = arith.constant 0 : i32
    return %c0_i32, %c0_i32_0 : i32, i32
  }
  func.func @transform_5(%arg0: i32) -> (i32, i32) {
    %c0_i32 = arith.constant 0 : i32
    %c0_i32_0 = arith.constant 0 : i32
    %c0_i32_1 = arith.constant 0 : i32
    return %c0_i32, %c0_i32_0 : i32, i32
  }
  func.func @transform_6(%arg0: i32) -> (i32, i32) {
    %c0_i32 = arith.constant 0 : i32
    %c0_i32_0 = arith.constant 0 : i32
    %c0_i32_1 = arith.constant 0 : i32
    return %c0_i32, %c0_i32_0 : i32, i32
  }
  func.func @transform_7(%arg0: i32) -> (i32, i32) {
    %c0_i32 = arith.constant 0 : i32
    %c0_i32_0 = arith.constant 0 : i32
    %c0_i32_1 = arith.constant 0 : i32
    return %c0_i32, %c0_i32_0 : i32, i32
  }
  func.func @transform_8(%arg0: i32) -> (i32, i32) {
    %c0_i32 = arith.constant 0 : i32
    %c0_i32_0 = arith.constant 0 : i32
    return %arg0, %c0_i32 : i32, i32
  }
  func.func @transform_9(%arg0: i32) -> (i32, i32) {
    %c0_i32 = arith.constant 0 : i32
    %c0_i32_0 = arith.constant 0 : i32
    %c0_i32_1 = arith.constant 0 : i32
    return %c0_i32, %c0_i32_0 : i32, i32
  }
  func.func @transform_10(%arg0: i32) -> (i32, i32) {
    %c0_i32 = arith.constant 0 : i32
    %c0_i32_0 = arith.constant 0 : i32
    %c0_i32_1 = arith.constant 0 : i32
    return %c0_i32, %c0_i32_0 : i32, i32
  }
}

</mosaic_0001>

<bundles_post_ra>
// kernel: tpu_custom_call.1
= control target key start
LH: loop header
LB: loop body
LE: loop exit
PB: predicated region body
PF: predicated region fallthrough
CT: control target
= control target key end

     0   :  { %16 = vsyncpa [#allocation3], 0  ;;  %s1633_s0 = inlined_call_operand.hbm [shape: f32[16,32], index: 0, kind: input, shape index: {}]   ;;  %s1634_s1 = inlined_call_operand.hbm [shape: bf16[32,128], index: 1, kind: input, shape index: {}]   ;;  %s1635_s2 = inlined_call_operand.hbm [shape: bf16[32,128], index: 2, kind: input, shape index: {}]   ;;  %s1636_s3 = inlined_call_operand.vmem [shape: f32[1,128], index: 3, kind: input, shape index: {}]   ;;  %s1637_s4 = inlined_call_operand.vmem [shape: f32[1,32], index: 4, kind: input, shape index: {}]   ;;  %s1638_s5 = inlined_call_operand.vmem [shape: f32[1,32], index: 5, kind: input, shape index: {}]   ;;  %s1639_s6 = inlined_call_operand.vmem [shape: f32[2,32], index: 6, kind: input, shape index: {}]   ;;  %s1640_s7 = inlined_call_operand.vmem [shape: f32[2,32], index: 7, kind: input, shape index: {}]   ;;  %s1641_s8 = inlined_call_operand.hbm [shape: bf16[16,32], index: 8, kind: output, shape index: {0}]   ;;  %s1642_s9 = inlined_call_operand.hbm [shape: f32[2,32], index: 9, kind: output, shape index: {1}]   ;;  %s1643_s10 = inlined_call_operand.hbm [shape: f32[2,32], index: 10, kind: output, shape index: {2}]  }
   0x1   :  { %17 = vsyncpa [#allocation6], 0 }
   0x2   :  { %18 = vsyncpa [#allocation4], 0 }
   0x3   :  { %19 = vsyncpa [#allocation10], 0  ;;  %s1315_s13 = smov [#allocation5]   ;;  %s1175_s17 = scalar_lea.hbm %s1634_s1, 256 }
   0x4   :  { %s37_s14 = sshll.u32 %s1315_s13, 4  ;;  %p1176_p0 = scmp.ne.s32.totalorder %s1634_s1, %s1175_s17  ;;  %s38_s14 = int_to_ptr.vmem [resolvable:$true] %s37_s14 }
   0x5   :  { %p1179_p1 = scmp.lt.u32.totalorder %s1175_s17, %s1634_s1 }
   0x7   :  { %p1181_p2 = pnand %p1179_p1, %p1176_p0 }
   0x9   :  { %1184 = shalt.err (!%p1181_p2)
}
   0xa   :  { %s1185_s22 = scalar_lea.vmem %s38_s14, 256  ;;  %p1190_p4 = scmp.lt.s32.totalorder %s38_s14, %s38_s14 }
   0xb   :  { %p1186_p3 = scmp.ne.s32.totalorder %s38_s14, %s1185_s22  ;;  %p1191_p5 = scmp.lt.s32.totalorder %s1185_s22, %s1185_s22 }
   0xd   :  { %p1192_p6 = por %p1191_p5, %p1190_p4 }
   0xf   :  { %p1193_p7 = pnand %p1192_p6, %p1186_p3 }
  0x11   :  { %1196 = shalt.err (!%p1193_p7)
}
  0x12   :  { %s1316_s23 = smov 64   ;;  %s1317_s24 = smov 4  }
  0x13   :  { %43 = dma.hbm_to_vmem [thread:$0]  %s1634_s1, 256, %s38_s14, [#allocation6], %s1316_s23, %s1316_s23, %s1317_s24  }
  0x14   :  { %s1318_s27 = smov [#allocation2]   ;;  %s1197_s11 = scalar_lea.hbm %s1633_s0, 256 }
  0x15   :  { %s25_s28 = sshll.u32 %s1318_s27, 4  ;;  %p1198_p8 = scmp.ne.s32.totalorder %s1633_s0, %s1197_s11  ;;  %s26_s28 = int_to_ptr.vmem [resolvable:$true] %s25_s28 }
  0x16   :  { %p1201_p9 = scmp.lt.u32.totalorder %s1197_s11, %s1633_s0 }
  0x18   :  { %p1203_p10 = pnand %p1201_p9, %p1198_p8 }
  0x1a   :  { %1206 = shalt.err (!%p1203_p10)
}
  0x1b   :  { %s1207_s17 = scalar_lea.vmem %s26_s28, 256  ;;  %p1212_p12 = scmp.lt.s32.totalorder %s26_s28, %s26_s28 }
  0x1c   :  { %p1208_p11 = scmp.ne.s32.totalorder %s26_s28, %s1207_s17  ;;  %p1213_p13 = scmp.lt.s32.totalorder %s1207_s17, %s1207_s17 }
  0x1e   :  { %p1214_p0 = por %p1213_p13, %p1212_p12 }
  0x20   :  { %p1215_p1 = pnand %p1214_p0, %p1208_p11 }
  0x22   :  { %1218 = shalt.err (!%p1215_p1)
}
  0x23   :  { %s1319_s1 = smov 128   ;;  %s1320_s14 = smov 8  }
  0x24   :  { %31 = dma.hbm_to_vmem [thread:$0]  %s1633_s0, 256, %s26_s28, [#allocation3], %s1319_s1, %s1319_s1, %s1320_s14  }
  0x25   :  { %s1321_s20 = smov [#allocation7]   ;;  %s1219_s26 = scalar_lea.hbm %s1635_s2, 256 }
  0x26   :  { %s49_s21 = sshll.u32 %s1321_s20, 4  ;;  %p1220_p2 = scmp.ne.s32.totalorder %s1635_s2, %s1219_s26  ;;  %s50_s21 = int_to_ptr.vmem [resolvable:$true] %s49_s21 }
  0x27   :  { %p1223_p3 = scmp.lt.u32.totalorder %s1219_s26, %s1635_s2 }
  0x29   :  { %p1225_p4 = pnand %p1223_p3, %p1220_p2 }
  0x2b   :  { %1228 = shalt.err (!%p1225_p4)
}
  0x2c   :  { %s1229_s12 = scalar_lea.vmem %s50_s21, 256  ;;  %p1234_p6 = scmp.lt.s32.totalorder %s50_s21, %s50_s21 }
  0x2d   :  { %p1230_p5 = scmp.ne.s32.totalorder %s50_s21, %s1229_s12  ;;  %p1235_p7 = scmp.lt.s32.totalorder %s1229_s12, %s1229_s12 }
  0x2f   :  { %p1236_p8 = por %p1235_p7, %p1234_p6 }
  0x31   :  { %p1237_p9 = pnand %p1236_p8, %p1230_p5 }
  0x33   :  { %1240 = shalt.err (!%p1237_p9)
}
  0x34   :  { %55 = dma.hbm_to_vmem [thread:$0]  %s1635_s2, 256, %s50_s21, [#allocation6], %s1316_s23, %s1316_s23, %s1317_s24  }
  0x35   :  { %1307 = dma.done.wait [#allocation3], 256  }
  0x36   :  { %1308 = vsyncadd [#allocation3], 4294967040 }
  0x37   :  { %1309 = dma.done.wait [#allocation6], 512  }
  0x38   :  { %1310 = vsyncadd [#allocation6], 4294966784  ;;  %vm87_vm0 = vcmask 261120   ;;  %v85_v0 = vld [vmem:[#allocation2] sm:$0xff]  ;;  %v86_v1 = vld [vmem:[#allocation2 + $0x8] sm:$0xff]  ;;  %vm81_vm1 = vcmask 254976  }
  0x39   :  { %v88_v2 = vsel %vm87_vm0, %v85_v0, 0.0  ;;  %v91_v3 = vsel %vm87_vm0, %v86_v1, 0.0  ;;  %v80_v14 = vld [vmem:[%s1639_s6] sm:$0x3]  ;;  %v1322_v16 = vmov 0.0   ;;  %v1104_v17 = vld [vmem:[#allocation5] sm:$0xff]  }
  0x3a   :  { %89 = vadd.xlane.f32.xlu0 %v88_v2  ;;  %82 = vst.msk [vmem:[#allocation9] sm:$0x3] %vm81_vm1, %v80_v14  ;;  %v1434_v15 = vld [vmem:[#allocation7] sm:$0xff]   ;;  %1025 = vmatprep.subr.bf16.mxu1 %v1322_v16  ;;  %v1439_v18 = vld [vmem:[#allocation7 + $0x8] sm:$0xff]   ;;  %v1106_v19 = vld [vmem:[#allocation5 + $0x8] sm:$0xff]   ;;  %vm1323_vm2 = vmmov 0  }
  0x3b   :  { %1017 = vmatprep.subr.bf16.mxu0 %v1322_v16  ;;  %1026 = vmatpush3.bf16.msra.mxu1 %v1434_v15  ;;  %v83_v22 = vld [vmem:[%s1640_s7] sm:$0x3]  ;;  %s1324_s16 = smov 32   ;;  %vm384_vm3 = vcmask 254977   ;;  %vm556_vm4 = vcmask 257027   ;;  %vm299_vm5 = vcmask 253952  }
  0x3c   :  { %1018 = vmatpush3.bf16.msra.mxu0 %v1104_v17  ;;  %1027 = vmatprep.subr.bf16.mxu1 %v1322_v16  ;;  %84 = vst.msk [vmem:[#allocation11] sm:$0x3] %vm81_vm1, %v83_v22  ;;  %v950_v32 = vld [vmem:[%s1637_s4] ss:$0 sm:$0xff]  ;;  %vm470_vm6 = vcmask 256002   ;;  %vm898_vm7 = vcmask 261126  }
  0x3d   :  { %1019 = vmatprep.subr.bf16.mxu0 %v1322_v16  ;;  %1029 = vmatprep.mubr.msk.bf16.mxu1 %vm1323_vm2, %v1322_v16  ;;  %v951_v36 = vld [vmem:[%s1638_s5] ss:$0 sm:$0xff]  ;;  %s1326_s18 = smov [#allocation9]   ;;  %s1327_s20 = smov [#allocation11]  }
  0x3e   :  { %92 = vadd.xlane.f32.xlu0 %v91_v3  ;;  %1021 = vmatprep.mubr.msk.bf16.mxu0 %vm1323_vm2, %v1322_v16  ;;  %v952_v45 = vld [vmem:[%s1636_s3] ss:$0 sm:$0xff]  ;;  %s1325_s3 = smov 96   ;;  %s923_s19 = sshll.u32 %s1326_s18, 4  ;;  %s924_s19 = int_to_ptr.vmem [resolvable:$true] %s923_s19 }
  0x3f   :  { %1028 = vmatpush3.bf16.msra.mxu1 %v1439_v18  ;;  %s933_s21 = sshll.u32 %s1327_s20, 4  ;;  %s1328_s22 = smov [#allocation8]   ;;  %s934_s21 = int_to_ptr.vmem [resolvable:$true] %s933_s21 }
  0x40   :  { %1020 = vmatpush3.bf16.msra.mxu0 %v1106_v19  ;;  %1041 = vmatprep.subr.bf16.mxu1 %v1322_v16  ;;  %s910_s25 = sshll.u32 %s1328_s22, 4  ;;  %s1241_s26 = scalar_lea.vmem %s924_s19, 32  ;;  %s1586_s25 = int_to_ptr.vmem [resolvable:$true] %s910_s25 }
  0x41   :  { %v205_v20 = vld [vmem:[#allocation9] sm:$0x3]  ;;  %1033 = vmatprep.subr.bf16.mxu0 %v1322_v16  ;;  %p1242_p10 = scmp.ne.s32.totalorder %s924_s19, %s1241_s26  ;;  %p1246_p11 = scmp.lt.s32.totalorder %s924_s19, %s924_s19 }
  0x42   :  { %v207_v21 = vpack.c.bf16 %v205_v20, %v205_v20  ;;  %p1247_p12 = scmp.lt.s32.totalorder %s1241_s26, %s1241_s26 }
  0x43   :  { %v206_v23 = vld [vmem:[#allocation11] sm:$0x3] }
  0x44   :  { %1030 = vmatmul.mubr.msk.bf16.vlgmr.msra.gmra.mrb[0].mxu1 %vm87_vm0, %v207_v21  ;;  %p1248_p13 = por %p1247_p12, %p1246_p11 }
  0x45   :  { %1042 = vmatpush3.bf16.msra.mxu1 %v1434_v15  ;;  %1045 = vmatprep.mubr.msk.bf16.mxu1 %vm1323_vm2, %v1322_v16 }
  0x46   :  { %1043 = vmatprep.subr.bf16.mxu1 %v1322_v16  ;;  %p1249_p0 = pnand %p1248_p13, %p1242_p10 }
  0x49   :  { %1044 = vmatpush3.bf16.msra.mxu1 %v1439_v18 }
  0x4a   :  { %1057 = vmatprep.subr.bf16.mxu1 %v1322_v16 }
  0xc7   :  { %v90_v4 = vpop.xlane.xlu0 %89 }
  0xc8   :  { %v95_v5 = vmul.f32 0.03125, %v90_v4 }
  0xca   :  { %v97_v6 = vsub.f32 %v85_v0, %v95_v5 }
  0xcb   :  { %v93_v7 = vpop.xlane.xlu0 %92 }
  0xcc   :  { %v96_v8 = vmul.f32 0.03125, %v93_v7  ;;  %v99_v9 = vmul.f32 %v97_v6, %v97_v6 }
  0xce   :  { %v98_v10 = vsub.f32 %v86_v1, %v96_v8  ;;  %v101_v11 = vsel %vm87_vm0, %v99_v9, 0.0 }
  0xcf   :  { %102 = vadd.xlane.f32.xlu1 %v101_v11 }
  0xd0   :  { %v100_v12 = vmul.f32 %v98_v10, %v98_v10 }
  0xd2   :  { %v104_v13 = vsel %vm87_vm0, %v100_v12, 0.0 }
  0xd3   :  { %105 = vadd.xlane.f32.xlu1 %v104_v13 }
  0xe4   :  { %272 = vrot.lane.b32.xlu1 %v206_v23, %s1324_s16 }
 0x117   :  { %v257_v41 = vpop.f32.mrb[0].mxu1 }
 0x118   :  { %v1031_v42 = vpop.f32.mrb[1].mxu1 }
 0x119   :  { %v260_v43 = vpop.f32.mrb[2].mxu1 }
 0x11a   :  { %v1032_v44 = vpop.f32.mrb[3].mxu1 }
 0x15c   :  { %v103_v24 = vpop.xlane.xlu1 %102 }
 0x15d   :  { %v107_v25 = vmul.f32 0.03125, %v103_v24 }
 0x15f   :  { %v109_v26 = vadd.f32 1e-05, %v107_v25 }
 0x160   :  { %v106_v27 = vpop.xlane.xlu1 %105 }
 0x161   :  { %1107 = vrsqrt.f32 %v109_v26  ;;  %v108_v28 = vmul.f32 0.03125, %v106_v27 }
 0x163   :  { %v110_v29 = vadd.f32 1e-05, %v108_v28 }
 0x164   :  { %v273_v60 = vpop.permute.xlu1 %272 }
 0x165   :  { %1109 = vrsqrt.f32 %v110_v29 }
 0x16b   :  { %v1108_v30 = vpop.eup %1107 }
 0x16c   :  { %v113_v31 = vmul.f32 %v1108_v30, %v97_v6 }
 0x16e   :  { %v122_v35 = vmul.f32 %v950_v32, %v113_v31 }
 0x16f   :  { %v1110_v33 = vpop.eup %1109 }
 0x170   :  { %v114_v34 = vmul.f32 %v1110_v33, %v98_v10  ;;  %v131_v38 = vadd.f32 %v951_v36, %v122_v35 }
 0x172   :  { %v123_v37 = vmul.f32 %v950_v32, %v114_v34 }
 0x174   :  { %v132_v39 = vadd.f32 %v951_v36, %v123_v37 }
 0x176   :  { %v133_v40 = vpack.c.bf16 %v132_v39, %v131_v38 }
 0x178   :  { %1022 = vmatmul.mubr.msk.bf16.vlgmr.msra.gmra.mrb[0].mxu0 %vm87_vm0, %v133_v40 }
 0x179   :  { %1034 = vmatpush3.bf16.msra.mxu0 %v1434_v15  ;;  %1037 = vmatprep.mubr.msk.bf16.mxu0 %vm1323_vm2, %v1322_v16 }
 0x17a   :  { %1035 = vmatprep.subr.bf16.mxu0 %v1322_v16 }
 0x17d   :  { %1036 = vmatpush3.bf16.msra.mxu0 %v1439_v18 }
 0x17e   :  { %1049 = vmatprep.subr.bf16.mxu0 %v1322_v16 }
 0x24b   :  { %v194_v46 = vpop.f32.mrb[0].mxu0 }
 0x24c   :  { %v1478_v47 = vadd.f32 %v952_v45, %v194_v46  ;;  %v1023_v48 = vpop.f32.mrb[1].mxu0 }
 0x24d   :  { %v197_v49 = vpop.f32.mrb[2].mxu0 }
 0x24e   :  { %v263_v50 = vadd.f32 %v257_v41, %v1478_v47  ;;  %v1481_v51 = vadd.f32 %v952_v45, %v197_v49  ;;  %v1024_v52 = vpop.f32.mrb[3].mxu0 }
 0x250   :  { %1111 = vtanh.f32 %v263_v50  ;;  %v959_v54 = vmul.f32 -1.442695, %v263_v50 }
 0x252   :  { %1113 = vpow2.f32 %v959_v54 }
 0x25a   :  { %v1112_v53 = vpop.eup %1111 }
 0x25b   :  { %277 = vrot.lane.b32.xlu0 %v1112_v53, %s1316_s23 }
 0x25c   :  { %v1114_v55 = vpop.eup %1113 }
 0x25d   :  { %v267_v56 = vadd.f32 1.0, %v1114_v55 }
 0x25f   :  { %1115 = vrcp.f32 %v267_v56 }
 0x269   :  { %v1116_v57 = vpop.eup %1115 }
 0x26a   :  { %v275_v61 = vmul.f32 %v1116_v57, %v273_v60 }
 0x2cd   :  { %v278_v58 = vpop.permute.xlu0 %277 }
 0x2ce   :  { %v280_v59 = vmul.f32 %v1116_v57, %v278_v58 }
 0x2d0   :  { %282 = vrot.lane.b32.xlu1 %v280_v59, %s1324_s16 }
 0x342   :  { %v283_v62 = vpop.permute.xlu1 %282 }
 0x343   :  { %v285_v63 = vadd.f32 %v283_v62, %v275_v61 }
 0x345   :  { %1117 = vtanh.f32 %v285_v63  ;;  %v358_v21 = vrot.slane %v285_v63, 6 }
 0x34f   :  { %v1118_v0 = vpop.eup %1117 }
 0x350   :  { %288 = vrot.lane.b32.xlu1 %v1118_v0, %s1316_s23 }
 0x3c2   :  { %v289_v1 = vpop.permute.xlu1 %288 }
 0x3c3   :  { %v291_v2 = vmul.f32 %v1116_v57, %v289_v1 }
 0x3c5   :  { %v1486_v3 = vpack.c.bf16 %v291_v2, %v291_v2 }
 0x3c7   :  { %301 = vrot.lane.b32.xlu0 %v1486_v3, %s1324_s16 }
 0x439   :  { %v302_v4 = vpop.permute.xlu0 %301 }
 0x43a   :  { %1038 = vmatmul.mubr.msk.bf16.vlgmr.msra.gmra.mrb[4].mxu0 %vm87_vm0, %v302_v4 }
 0x43b   :  { %1050 = vmatpush3.bf16.msra.mxu0 %v1434_v15  ;;  %1053 = vmatprep.mubr.msk.bf16.mxu0 %vm1323_vm2, %v1322_v16 }
 0x43c   :  { %1051 = vmatprep.subr.bf16.mxu0 %v1322_v16 }
 0x43f   :  { %1052 = vmatpush3.bf16.msra.mxu0 %v1439_v18 }
 0x440   :  { %1065 = vmatprep.subr.bf16.mxu0 %v1322_v16 }
 0x50d   :  { %v340_v5 = vpop.f32.mrb[4].mxu0 }
 0x50e   :  { %v347_v6 = vrot.slane %v340_v5, 6  ;;  %v1039_v7 = vpop.f32.mrb[5].mxu0 }
 0x50f   :  { %v343_v8 = vpop.f32.mrb[6].mxu0 }
 0x510   :  { %v349_v9 = vadd.f32 %v347_v6, %v1478_v47  ;;  %v1040_v10 = vpop.f32.mrb[7].mxu0 }
 0x512   :  { %1119 = vtanh.f32 %v349_v9  ;;  %v962_v12 = vmul.f32 -1.442695, %v349_v9 }
 0x514   :  { %1121 = vpow2.f32 %v962_v12 }
 0x51c   :  { %v1120_v11 = vpop.eup %1119 }
 0x51d   :  { %362 = vrot.lane.b32.xlu1 %v1120_v11, %s1316_s23 }
 0x51e   :  { %v1122_v13 = vpop.eup %1121 }
 0x51f   :  { %v353_v14 = vadd.f32 1.0, %v1122_v13 }
 0x521   :  { %1123 = vrcp.f32 %v353_v14 }
 0x52b   :  { %v1124_v17 = vpop.eup %1123 }
 0x52c   :  { %v360_v22 = vmul.f32 %v1124_v17, %v358_v21 }
 0x58f   :  { %v363_v19 = vpop.permute.xlu1 %362 }
 0x590   :  { %v365_v20 = vmul.f32 %v1124_v17, %v363_v19 }
 0x592   :  { %367 = vrot.lane.b32.xlu0 %v365_v20, %s1324_s16 }
 0x604   :  { %v368_v23 = vpop.permute.xlu0 %367 }
 0x605   :  { %v370_v24 = vadd.f32 %v368_v23, %v360_v22 }
 0x607   :  { %1125 = vtanh.f32 %v370_v24  ;;  %v444_v44 = vrot.slane %v370_v24, 6 }
 0x611   :  { %v1126_v25 = vpop.eup %1125 }
 0x612   :  { %373 = vrot.lane.b32.xlu1 %v1126_v25, %s1316_s23 }
 0x684   :  { %v374_v26 = vpop.permute.xlu1 %373 }
 0x685   :  { %v376_v27 = vmul.f32 %v1124_v17, %v374_v26 }
 0x687   :  { %v1501_v28 = vpack.c.bf16 %v376_v27, %v376_v27 }
 0x689   :  { %v386_v29 = vrot.slane %v1501_v28, 1 }
 0x68b   :  { %387 = vrot.lane.b32.xlu0 %v386_v29, %s1324_s16 }
 0x6fd   :  { %v388_v30 = vpop.permute.xlu0 %387 }
 0x6fe   :  { %1046 = vmatmul.mubr.msk.bf16.vlgmr.msra.gmra.mrb[4].mxu1 %vm87_vm0, %v388_v30 }
 0x6ff   :  { %1058 = vmatpush3.bf16.msra.mxu1 %v1434_v15  ;;  %1061 = vmatprep.mubr.msk.bf16.mxu1 %vm1323_vm2, %v1322_v16 }
 0x700   :  { %1059 = vmatprep.subr.bf16.mxu1 %v1322_v16 }
 0x703   :  { %1060 = vmatpush3.bf16.msra.mxu1 %v1439_v18 }
 0x704   :  { %1073 = vmatprep.subr.bf16.mxu1 %v1322_v16 }
 0x7d1   :  { %v426_v31 = vpop.f32.mrb[4].mxu1 }
 0x7d2   :  { %v433_v32 = vrot.slane %v426_v31, 4  ;;  %v1047_v33 = vpop.f32.mrb[5].mxu1 }
 0x7d3   :  { %v429_v34 = vpop.f32.mrb[6].mxu1 }
 0x7d4   :  { %v435_v35 = vadd.f32 %v433_v32, %v1478_v47  ;;  %v1048_v36 = vpop.f32.mrb[7].mxu1 }
 0x7d6   :  { %1127 = vtanh.f32 %v435_v35  ;;  %v965_v38 = vmul.f32 -1.442695, %v435_v35 }
 0x7d8   :  { %1129 = vpow2.f32 %v965_v38 }
 0x7e0   :  { %v1128_v37 = vpop.eup %1127 }
 0x7e1   :  { %448 = vrot.lane.b32.xlu1 %v1128_v37, %s1316_s23 }
 0x7e2   :  { %v1130_v39 = vpop.eup %1129 }
 0x7e3   :  { %v439_v40 = vadd.f32 1.0, %v1130_v39 }
 0x7e5   :  { %1131 = vrcp.f32 %v439_v40 }
 0x7ef   :  { %v1132_v41 = vpop.eup %1131 }
 0x7f0   :  { %v446_v45 = vmul.f32 %v1132_v41, %v444_v44 }
 0x853   :  { %v449_v42 = vpop.permute.xlu1 %448 }
 0x854   :  { %v451_v43 = vmul.f32 %v1132_v41, %v449_v42 }
 0x856   :  { %453 = vrot.lane.b32.xlu0 %v451_v43, %s1324_s16 }
 0x8c8   :  { %v454_v46 = vpop.permute.xlu0 %453 }
 0x8c9   :  { %v456_v48 = vadd.f32 %v454_v46, %v446_v45 }
 0x8cb   :  { %1133 = vtanh.f32 %v456_v48  ;;  %v530_v6 = vrot.slane %v456_v48, 6 }
 0x8d5   :  { %v1134_v49 = vpop.eup %1133 }
 0x8d6   :  { %459 = vrot.lane.b32.xlu1 %v1134_v49, %s1316_s23 }
 0x948   :  { %v460_v50 = vpop.permute.xlu1 %459 }
 0x949   :  { %v462_v52 = vmul.f32 %v1132_v41, %v460_v50 }
 0x94b   :  { %v1516_v53 = vpack.c.bf16 %v462_v52, %v462_v52 }
 0x94d   :  { %v472_v54 = vrot.slane %v1516_v53, 2 }
 0x94f   :  { %473 = vrot.lane.b32.xlu0 %v472_v54, %s1324_s16 }
 0x9c1   :  { %v474_v55 = vpop.permute.xlu0 %473 }
 0x9c2   :  { %1054 = vmatmul.mubr.msk.bf16.vlgmr.msra.gmra.mrb[8].mxu0 %vm87_vm0, %v474_v55 }
 0x9c3   :  { %1066 = vmatpush3.bf16.msra.mxu0 %v1434_v15  ;;  %1069 = vmatprep.mubr.msk.bf16.mxu0 %vm1323_vm2, %v1322_v16 }
 0x9c4   :  { %1067 = vmatprep.subr.bf16.mxu0 %v1322_v16 }
 0x9c7   :  { %1068 = vmatpush3.bf16.msra.mxu0 %v1439_v18 }
 0x9c8   :  { %1081 = vmatprep.subr.bf16.mxu0 %v1322_v16 }
 0xa95   :  { %v512_v56 = vpop.f32.mrb[8].mxu0 }
 0xa96   :  { %v519_v57 = vrot.slane %v512_v56, 2  ;;  %v1055_v58 = vpop.f32.mrb[9].mxu0 }
 0xa97   :  { %v515_v59 = vpop.f32.mrb[10].mxu0 }
 0xa98   :  { %v521_v60 = vadd.f32 %v519_v57, %v1478_v47  ;;  %v1056_v61 = vpop.f32.mrb[11].mxu0 }
 0xa9a   :  { %1135 = vtanh.f32 %v521_v60  ;;  %v968_v63 = vmul.f32 -1.442695, %v521_v60 }
 0xa9c   :  { %1137 = vpow2.f32 %v968_v63 }
 0xaa4   :  { %v1136_v62 = vpop.eup %1135 }
 0xaa5   :  { %534 = vrot.lane.b32.xlu1 %v1136_v62, %s1316_s23 }
 0xaa6   :  { %v1138_v0 = vpop.eup %1137 }
 0xaa7   :  { %v525_v1 = vadd.f32 1.0, %v1138_v0 }
 0xaa9   :  { %1139 = vrcp.f32 %v525_v1 }
 0xab3   :  { %v1140_v2 = vpop.eup %1139 }
 0xab4   :  { %v532_v7 = vmul.f32 %v1140_v2, %v530_v6 }
 0xb17   :  { %v535_v4 = vpop.permute.xlu1 %534 }
 0xb18   :  { %v537_v5 = vmul.f32 %v1140_v2, %v535_v4 }
 0xb1a   :  { %539 = vrot.lane.b32.xlu0 %v537_v5, %s1324_s16 }
 0xb8c   :  { %v540_v8 = vpop.permute.xlu0 %539 }
 0xb8d   :  { %v542_v9 = vadd.f32 %v540_v8, %v532_v7 }
 0xb8f   :  { %1141 = vtanh.f32 %v542_v9  ;;  %v613_v31 = vrot.slane %v542_v9, 6 }
 0xb99   :  { %v1142_v47 = vpop.eup %1141 }
 0xb9a   :  { %545 = vrot.lane.b32.xlu1 %v1142_v47, %s1316_s23 }
 0xc0c   :  { %v546_v10 = vpop.permute.xlu1 %545 }
 0xc0d   :  { %v548_v11 = vmul.f32 %v1140_v2, %v546_v10 }
 0xc0f   :  { %v1531_v12 = vpack.c.bf16 %v548_v11, %v548_v11 }
 0xc11   :  { %v558_v13 = vrot.slane %v1531_v12, 3 }
 0xc13   :  { %559 = vrot.lane.b32.xlu0 %v558_v13, %s1324_s16 }
 0xc85   :  { %v560_v14 = vpop.permute.xlu0 %559 }
 0xc86   :  { %1062 = vmatmul.mubr.msk.bf16.vlgmr.msra.gmra.mrb[8].mxu1 %vm87_vm0, %v560_v14 }
 0xc87   :  { %1074 = vmatpush3.bf16.msra.mxu1 %v1434_v15  ;;  %1077 = vmatprep.mubr.msk.bf16.mxu1 %vm1323_vm2, %v1322_v16 }
 0xc88   :  { %1075 = vmatprep.subr.bf16.mxu1 %v1322_v16 }
 0xc8b   :  { %1076 = vmatpush3.bf16.msra.mxu1 %v1439_v18 }
 0xd59   :  { %v598_v17 = vpop.f32.mrb[8].mxu1 }
 0xd5a   :  { %v604_v19 = vadd.f32 %v598_v17, %v1481_v51  ;;  %v1063_v20 = vpop.f32.mrb[9].mxu1 }
 0xd5b   :  { %v601_v21 = vpop.f32.mrb[10].mxu1 }
 0xd5c   :  { %1143 = vtanh.f32 %v604_v19  ;;  %v1064_v22 = vpop.f32.mrb[11].mxu1  ;;  %v971_v24 = vmul.f32 -1.442695, %v604_v19 }
 0xd5e   :  { %1145 = vpow2.f32 %v971_v24 }
 0xd66   :  { %v1144_v23 = vpop.eup %1143 }
 0xd67   :  { %617 = vrot.lane.b32.xlu1 %v1144_v23, %s1316_s23 }
 0xd68   :  { %v1146_v25 = vpop.eup %1145 }
 0xd69   :  { %v608_v26 = vadd.f32 1.0, %v1146_v25 }
 0xd6b   :  { %1147 = vrcp.f32 %v608_v26 }
 0xd75   :  { %v1148_v27 = vpop.eup %1147 }
 0xd76   :  { %v615_v32 = vmul.f32 %v1148_v27, %v613_v31 }
 0xdd9   :  { %v618_v29 = vpop.permute.xlu1 %617 }
 0xdda   :  { %v620_v30 = vmul.f32 %v1148_v27, %v618_v29 }
 0xddc   :  { %622 = vrot.lane.b32.xlu0 %v620_v30, %s1324_s16 }
 0xe4e   :  { %v623_v33 = vpop.permute.xlu0 %622 }
 0xe4f   :  { %v625_v34 = vadd.f32 %v623_v33, %v615_v32 }
 0xe51   :  { %1149 = vtanh.f32 %v625_v34 }
 0xe5b   :  { %v1150_v35 = vpop.eup %1149 }
 0xe5c   :  { %628 = vrot.lane.b32.xlu1 %v1150_v35, %s1316_s23 }
 0xece   :  { %v629_v36 = vpop.permute.xlu1 %628 }
 0xecf   :  { %v631_v37 = vmul.f32 %v1148_v27, %v629_v36 }
 0xed1   :  { %v1545_v38 = vpack.c.bf16 %v631_v37, %v631_v37 }
 0xed3   :  { %640 = vrot.lane.b32.xlu0 %v1545_v38, %s1324_s16 }
 0xf45   :  { %v641_v39 = vpop.permute.xlu0 %640 }
 0xf46   :  { %1070 = vmatmul.mubr.msk.bf16.vlgmr.msra.gmra.mrb[12].mxu0 %vm87_vm0, %v641_v39 }
 0xf47   :  { %1082 = vmatpush3.bf16.msra.mxu0 %v1434_v15  ;;  %1085 = vmatprep.mubr.msk.bf16.mxu0 %vm1323_vm2, %v1322_v16 }
 0xf48   :  { %1083 = vmatprep.subr.bf16.mxu0 %v1322_v16 }
 0xf4b   :  { %1084 = vmatpush3.bf16.msra.mxu0 %v1439_v18  ;;  %v697_v18 = vrot.slane %v625_v34, 6 }
0x1019   :  { %v679_v40 = vpop.f32.mrb[12].mxu0 }
0x101a   :  { %v686_v41 = vrot.slane %v679_v40, 6  ;;  %v1071_v42 = vpop.f32.mrb[13].mxu0 }
0x101b   :  { %v682_v43 = vpop.f32.mrb[14].mxu0 }
0x101c   :  { %v688_v44 = vadd.f32 %v686_v41, %v1481_v51  ;;  %v1072_v45 = vpop.f32.mrb[15].mxu0 }
0x101e   :  { %1151 = vtanh.f32 %v688_v44  ;;  %v974_v48 = vmul.f32 -1.442695, %v688_v44 }
0x1020   :  { %1153 = vpow2.f32 %v974_v48 }
0x1028   :  { %v1152_v46 = vpop.eup %1151 }
0x1029   :  { %701 = vrot.lane.b32.xlu1 %v1152_v46, %s1316_s23 }
0x102a   :  { %v1154_v15 = vpop.eup %1153 }
0x102b   :  { %v692_v49 = vadd.f32 1.0, %v1154_v15 }
0x102d   :  { %1155 = vrcp.f32 %v692_v49 }
0x1037   :  { %v1156_v50 = vpop.eup %1155 }
0x1038   :  { %v699_v54 = vmul.f32 %v1156_v50, %v697_v18 }
0x109b   :  { %v702_v16 = vpop.permute.xlu1 %701 }
0x109c   :  { %v704_v52 = vmul.f32 %v1156_v50, %v702_v16 }
0x109e   :  { %706 = vrot.lane.b32.xlu0 %v704_v52, %s1324_s16 }
0x1110   :  { %v707_v55 = vpop.permute.xlu0 %706 }
0x1111   :  { %v709_v56 = vadd.f32 %v707_v55, %v699_v54 }
0x1113   :  { %1157 = vtanh.f32 %v709_v56  ;;  %v782_v13 = vrot.slane %v709_v56, 6 }
0x111d   :  { %v1158_v57 = vpop.eup %1157 }
0x111e   :  { %712 = vrot.lane.b32.xlu1 %v1158_v57, %s1316_s23 }
0x1190   :  { %v713_v58 = vpop.permute.xlu1 %712 }
0x1191   :  { %v715_v59 = vmul.f32 %v1156_v50, %v713_v58 }
0x1193   :  { %v716_v60 = vpack.c.bf16 %v715_v59, %v715_v59 }
0x1195   :  { %v724_v61 = vrot.slane %v716_v60, 1 }
0x1197   :  { %725 = vrot.lane.b32.xlu0 %v724_v61, %s1324_s16 }
0x1209   :  { %v726_v62 = vpop.permute.xlu0 %725 }
0x120a   :  { %1078 = vmatmul.mubr.msk.bf16.vlgmr.msra.gmra.mrb[12].mxu1 %vm87_vm0, %v726_v62 }
0x12dd   :  { %v764_v63 = vpop.f32.mrb[12].mxu1 }
0x12de   :  { %v771_v0 = vrot.slane %v764_v63, 4  ;;  %v1079_v1 = vpop.f32.mrb[13].mxu1 }
0x12df   :  { %v767_v2 = vpop.f32.mrb[14].mxu1 }
0x12e0   :  { %v773_v4 = vadd.f32 %v771_v0, %v1481_v51  ;;  %v1080_v5 = vpop.f32.mrb[15].mxu1 }
0x12e2   :  { %1159 = vtanh.f32 %v773_v4  ;;  %v977_v7 = vmul.f32 -1.442695, %v773_v4 }
0x12e4   :  { %1161 = vpow2.f32 %v977_v7 }
0x12ec   :  { %v1160_v6 = vpop.eup %1159 }
0x12ed   :  { %786 = vrot.lane.b32.xlu1 %v1160_v6, %s1316_s23 }
0x12ee   :  { %v1162_v8 = vpop.eup %1161 }
0x12ef   :  { %v777_v9 = vadd.f32 1.0, %v1162_v8 }
0x12f1   :  { %1163 = vrcp.f32 %v777_v9 }
0x12fb   :  { %v1164_v47 = vpop.eup %1163 }
0x12fc   :  { %v784_v14 = vmul.f32 %v1164_v47, %v782_v13 }
0x135f   :  { %v787_v10 = vpop.permute.xlu1 %786 }
0x1360   :  { %v789_v11 = vmul.f32 %v1164_v47, %v787_v10 }
0x1362   :  { %791 = vrot.lane.b32.xlu0 %v789_v11, %s1324_s16 }
0x13d4   :  { %v792_v17 = vpop.permute.xlu0 %791 }
0x13d5   :  { %v794_v19 = vadd.f32 %v792_v17, %v784_v14 }
0x13d7   :  { %1165 = vtanh.f32 %v794_v19 }
0x13e1   :  { %v1166_v20 = vpop.eup %1165 }
0x13e2   :  { %797 = vrot.lane.b32.xlu1 %v1166_v20, %s1316_s23 }
0x1454   :  { %v798_v21 = vpop.permute.xlu1 %797 }
0x1455   :  { %v800_v22 = vmul.f32 %v1164_v47, %v798_v21 }
0x1457   :  { %v801_v23 = vpack.c.bf16 %v800_v22, %v800_v22 }
0x1459   :  { %v809_v24 = vrot.slane %v801_v23, 2 }
0x145b   :  { %810 = vrot.lane.b32.xlu0 %v809_v24, %s1324_s16 }
0x14cd   :  { %v811_v25 = vpop.permute.xlu0 %810 }
0x14ce   :  { %1086 = vmatmul.mubr.msk.bf16.vlgmr.msra.gmra.mrb[16].mxu0 %vm87_vm0, %v811_v25 }
0x15a1   :  { %v849_v26 = vpop.f32.mrb[16].mxu0 }
0x15a2   :  { %v856_v27 = vrot.slane %v849_v26, 2  ;;  %v1087_v29 = vpop.f32.mrb[17].mxu0 }
0x15a3   :  { %v852_v30 = vpop.f32.mrb[18].mxu0 }
0x15a4   :  { %v858_v31 = vadd.f32 %v856_v27, %v1481_v51  ;;  %v1088_v32 = vpop.f32.mrb[19].mxu0  ;;  %v867_v51 = vrot.slane %v794_v19, 6 }
0x15a6   :  { %1167 = vtanh.f32 %v858_v31  ;;  %v980_v34 = vmul.f32 -1.442695, %v858_v31 }
0x15a8   :  { %1169 = vpow2.f32 %v980_v34 }
0x15b0   :  { %v1168_v33 = vpop.eup %1167 }
0x15b1   :  { %871 = vrot.lane.b32.xlu1 %v1168_v33, %s1316_s23 }
0x15b2   :  { %v1170_v35 = vpop.eup %1169 }
0x15b3   :  { %v862_v36 = vadd.f32 1.0, %v1170_v35 }
0x15b5   :  { %1171 = vrcp.f32 %v862_v36 }
0x15bf   :  { %v1172_v37 = vpop.eup %1171 }
0x15c0   :  { %v869_v41 = vmul.f32 %v1172_v37, %v867_v51 }
0x1623   :  { %v872_v39 = vpop.permute.xlu1 %871 }
0x1624   :  { %v874_v40 = vmul.f32 %v1172_v37, %v872_v39 }
0x1626   :  { %876 = vrot.lane.b32.xlu0 %v874_v40, %s1324_s16 }
0x162a   :  { %381 = vrot.lane.b32.xlu0 %v1501_v28, %s1324_s16 }
0x162e   :  { %553 = vrot.lane.b32.xlu0 %v1531_v12, %s1324_s16 }
0x1632   :  { %720 = vrot.lane.b32.xlu0 %v716_v60, %s1324_s16 }
0x1698   :  { %v877_v42 = vpop.permute.xlu0 %876 }
0x1699   :  { %v879_v43 = vadd.f32 %v877_v42, %v869_v41 }
0x169b   :  { %1173 = vtanh.f32 %v879_v43 }
0x169c   :  { %v382_v44 = vpop.permute.xlu0 %381 }
0x169d   :  { %385 = vst.msk [vmem:[#allocation8] sm:$0x2] %vm384_vm3, %v382_v44 }
0x16a0   :  { %v554_v45 = vpop.permute.xlu0 %553 }
0x16a1   :  { %557 = vst.msk [vmem:[#allocation8] sm:$0x8] %vm556_vm4, %v554_v45 }
0x16a4   :  { %v721_v46 = vpop.permute.xlu0 %720 }
0x16a5   :  { %v1174_v48 = vpop.eup %1173  ;;  %723 = vst.msk [vmem:[#allocation8 + $0x4] sm:$0x2] %vm384_vm3, %v721_v46 }
0x16a6   :  { %882 = vrot.lane.b32.xlu1 %v1174_v48, %s1316_s23 }
0x16aa   :  { %296 = vrot.lane.b32.xlu1 %v1486_v3, %s1324_s16 }
0x16ae   :  { %467 = vrot.lane.b32.xlu1 %v1516_v53, %s1324_s16 }
0x16b2   :  { %636 = vrot.lane.b32.xlu1 %v1545_v38, %s1324_s16 }
0x16b6   :  { %805 = vrot.lane.b32.xlu1 %v801_v23, %s1324_s16 }
0x16ba   :  { %901 = vrot.lane.b32.xlu1 %v879_v43, %s1325_s3 }
0x1718   :  { %v883_v28 = vpop.permute.xlu1 %882 }
0x1719   :  { %v885_v12 = vmul.f32 %v1172_v37, %v883_v28 }
0x171b   :  { %895 = vrot.lane.b32.xlu0 %v885_v12, %s1324_s16  ;;  %v989_v49 = vpack.c.bf16 %v885_v12, %v885_v12 }
0x171c   :  { %v297_v15 = vpop.permute.xlu1 %296 }
0x171d   :  { %300 = vst.msk [vmem:[#allocation8] sm:$0x1] %vm299_vm5, %v297_v15 }
0x171f   :  { %890 = vrot.lane.b32.xlu0 %v989_v49, %s1324_s16 }
0x1720   :  { %v468_v3 = vpop.permute.xlu1 %467 }
0x1721   :  { %471 = vst.msk [vmem:[#allocation8] sm:$0x4] %vm470_vm6, %v468_v3 }
0x1724   :  { %v637_v53 = vpop.permute.xlu1 %636 }
0x1725   :  { %639 = vst.msk [vmem:[#allocation8 + $0x4] sm:$0x1] %vm299_vm5, %v637_v53 }
0x1728   :  { %v806_v38 = vpop.permute.xlu1 %805 }
0x1729   :  { %808 = vst.msk [vmem:[#allocation8 + $0x4] sm:$0x4] %vm470_vm6, %v806_v38 }
0x172c   :  { %v902_v50 = vpop.permute.xlu1 %901 }
0x172d   :  { %904 = vst.msk [vmem:[#allocation11 - $0x6] sm:$0xc0] %vm898_vm7, %v902_v50 }
0x178d   :  { %v896_v16 = vpop.permute.xlu0 %895 }
0x178e   :  { %899 = vst.msk [vmem:[#allocation9 - $0x6] sm:$0xc0] %vm898_vm7, %v896_v16 }
0x178f   :  { %1252 = shalt.err (!%p1249_p0)
}
0x1790   :  { %s1253_s30 = scalar_lea.hbm %s1642_s9, 32 }
0x1791   :  { %p1254_p1 = scmp.ne.s32.totalorder %s1642_s9, %s1253_s30  ;;  %p1257_p2 = scmp.lt.u32.totalorder %s1253_s30, %s1642_s9 }
0x1793   :  { %p1259_p3 = pnand %p1257_p2, %p1254_p1 }
0x1795   :  { %1262 = shalt.err (!%p1259_p3)
}
0x1796   :  { %926 = dma.vmem_to_hbm [thread:$0]  %s924_s19, 32, %s1642_s9, [#allocation10]  }
0x1797   :  { %s1263_s6 = scalar_lea.vmem %s934_s21, 32  ;;  %p1268_p5 = scmp.lt.s32.totalorder %s934_s21, %s934_s21 }
0x1798   :  { %p1264_p4 = scmp.ne.s32.totalorder %s934_s21, %s1263_s6  ;;  %p1269_p6 = scmp.lt.s32.totalorder %s1263_s6, %s1263_s6 }
0x179a   :  { %p1270_p7 = por %p1269_p6, %p1268_p5 }
0x179c   :  { %p1271_p8 = pnand %p1270_p7, %p1264_p4 }
0x179e   :  { %1274 = shalt.err (!%p1271_p8)
}
0x179f   :  { %s1275_s7 = scalar_lea.hbm %s1643_s10, 32 }
0x17a0   :  { %p1276_p9 = scmp.ne.s32.totalorder %s1643_s10, %s1275_s7  ;;  %p1279_p10 = scmp.lt.u32.totalorder %s1275_s7, %s1643_s10 }
0x17a2   :  { %p1281_p11 = pnand %p1279_p10, %p1276_p9 }
0x17a4   :  { %1284 = shalt.err (!%p1281_p11)
}
0x17a5   :  { %936 = dma.vmem_to_hbm [thread:$0]  %s934_s21, 32, %s1643_s10, [#allocation10]   ;;  %v891_v52 = vpop.permute.xlu0 %890 }
0x17a6   :  { %893 = vst.msk [vmem:[#allocation8 + $0x4] sm:$0x8] %vm556_vm4, %v891_v52  ;;  %s1285_s3 = scalar_lea.vmem %s1586_s25, 128  ;;  %p1290_p13 = scmp.lt.s32.totalorder %s1586_s25, %s1586_s25 }
0x17a7   :  { %p1286_p12 = scmp.ne.s32.totalorder %s1586_s25, %s1285_s3  ;;  %p1291_p0 = scmp.lt.s32.totalorder %s1285_s3, %s1285_s3 }
0x17a9   :  { %p1292_p1 = por %p1291_p0, %p1290_p13 }
0x17ab   :  { %p1293_p2 = pnand %p1292_p1, %p1286_p12 }
0x17ad   :  { %1296 = shalt.err (!%p1293_p2)
}
0x17ae   :  { %s1297_s20 = scalar_lea.hbm %s1641_s8, 128 }
0x17af   :  { %p1298_p3 = scmp.ne.s32.totalorder %s1641_s8, %s1297_s20  ;;  %p1301_p4 = scmp.lt.u32.totalorder %s1297_s20, %s1641_s8 }
0x17b1   :  { %p1303_p5 = pnand %p1301_p4, %p1298_p3 }
0x17b3   :  { %1306 = shalt.err (!%p1303_p5)
}
0x17b4   :  { %916 = dma.vmem_to_hbm [thread:$0]  %s1586_s25, 128, %s1641_s8, [#allocation4], %s1316_s23, %s1316_s23, %s1317_s24  }
0x17b5   :  { %1311 = dma.done.wait [#allocation4], 128  }
0x17b6   :  { %1312 = vsyncadd [#allocation4], 4294967168 }
0x17b7   :  { %1313 = dma.done.wait [#allocation10], 64  }
0x17b8   :  { %1314 = vsyncadd [#allocation10], 4294967232 }
0x17b9   :  { %946 = vsyncpa [#allocation3], 1 }
0x17ba   :  { %947 = vsyncpa [#allocation6], 1 }
0x17bb   :  { %948 = vsyncpa [#allocation4], 1 }
0x17bc   :  { %949 = vsyncpa [#allocation10], 1 }

</bundles_post_ra>
